<compile_context>
chip_gen: v7x
topology: tpu7x:2x2x1
jax: 0.10.0
libtpu: 0.0.40
codegen_flags: <defaults>
</compile_context>

<pallas_src>
import functools

import jax
import jax.numpy as jnp
from jax.experimental import pallas as pl
from jax.experimental.pallas import tpu as pltpu


# ---------------------------------------------------------------------------
# Kernel
# ---------------------------------------------------------------------------
def _pyramid_kernel(x_ref, *refs, pool, chain, slot_for_level, n_p, n_out,
                    staging, binarize):
    """Cascaded 2x2 pooling over a (B*H, W) block of image planes.

    refs = [pooling-matrix refs] + [output refs (one per requested scale)]
           + [optional f32 VMEM scratch]
    """
    p_refs = refs[:n_p]
    out_refs = refs[n_p:n_p + n_out]
    scratch = refs[n_p + n_out] if len(refs) > n_p + n_out else None

    R, W = x_ref.shape

    if staging:
        # Cast the (uint8 / bf16 / f16) block to f32 once; all stages then read
        # this f32 VMEM copy.
        scratch[...] = x_ref[...].astype(jnp.float32)
        src = scratch
    else:
        src = x_ref

    Rc, Wc = R, W
    last = len(chain) - 1
    for lvl, k in enumerate(chain):          # k = cumulative window (2, 4, 8, ...)
        Ro, Wo = Rc // 2, Wc // 2

        # --- H-window reduce: two sublane-strided row reads, f32 accumulate ---
        top = src[pl.ds(0, Ro, stride=2), 0:Wc].astype(jnp.float32)
        bot = src[pl.ds(1, Ro, stride=2), 0:Wc].astype(jnp.float32)

        # --- W-window (lane) reduce on the MXU via static 0/1 matrices ---
        if pool == "avg":
            rh = top + bot                                        # (Ro, Wc) partial sums
            res = jnp.dot(rh, p_refs[0][0:Wc, 0:Wo],
                          precision=jax.lax.Precision.HIGHEST,
                          preferred_element_type=jnp.float32)      # (Ro, Wo) window sums
        else:  # max
            rh = jnp.maximum(top, bot)
            even = jnp.dot(rh, p_refs[0][0:Wc, 0:Wo],
                           precision=jax.lax.Precision.HIGHEST,
                           preferred_element_type=jnp.float32)
            odd = jnp.dot(rh, p_refs[1][0:Wc, 0:Wo],
                          precision=jax.lax.Precision.HIGHEST,
                          preferred_element_type=jnp.float32)
            res = jnp.maximum(even, odd)                           # (Ro, Wo) window maxes

        # --- emit this scale's output if it was requested ---
        slot = slot_for_level[lvl]
        if slot is not None:
            o_ref = out_refs[slot]
            if binarize:                       # bool path: nonzero -> True
                o_ref[...] = (res > 0.0).astype(o_ref.dtype)
            elif pool == "avg":
                o_ref[...] = (res * (1.0 / (k * k))).astype(o_ref.dtype)
            else:
                o_ref[...] = res.astype(o_ref.dtype)

        # --- carry the f32 result for the next cascade stage ---
        if lvl != last:
            scratch[0:Ro, 0:Wo] = res
            src = scratch
        Rc, Wc = Ro, Wo


# ---------------------------------------------------------------------------
# Block-size selection (VMEM budget + tiling legality + >=2 grid steps)
# ---------------------------------------------------------------------------
def _sublane_multiple(itemsize):
    # native (sublane, lane) tile is (8 * packing, 128); packing = 4 / itemsize
    return 8 * max(1, 4 // int(itemsize))


def _choose_planes_per_block(NC, H, W, out_ks, chain, in_itemsize, out_itemsize,
                             staging, n_p):
    in_mult = _sublane_multiple(in_itemsize)
    out_mult = _sublane_multiple(out_itemsize)

    def block_shapes_ok(B):
        if B == NC:                 # blocks cover the full arrays -> always legal
            return True
        if (B * H) % in_mult:
            return False
        return all(((B * H) // k) % out_mult == 0 for k in out_ks)

    def vmem_bytes(B):
        r = B * H
        b = 2 * r * W * in_itemsize                                   # input (2x buffered)
        b += sum(2 * (r // k) * (W // k) * out_itemsize for k in out_ks)
        if staging:
            b += r * W * 4                                            # f32 staging/cascade
        elif len(chain) > 1:
            b += (r // 2) * (W // 2) * 4
        b += n_p * W * (W // 2) * 4                                   # resident P matrices
        return b

    budget = 8 * 1024 * 1024        # comfortably under v5e's 16 MiB scoped default
    divisors = [d for d in range(1, NC + 1) if NC % d == 0]
    # Prefer >=2 grid steps so "parallel" can shard across v7x's two TensorCores.
    for limit in (max(1, NC // 2), NC):
        good = [d for d in divisors
                if d <= limit and block_shapes_ok(d) and vmem_bytes(d) <= budget]
        if good:
            return max(good)
    # TODO(synk): planes too large even for B=1 need spatial (row) tiling.
    return 1 if block_shapes_ok(1) else NC


# ---------------------------------------------------------------------------
# pallas_call builder
# ---------------------------------------------------------------------------
def _build_pyramid_call(NC, H, W, out_ks, chain, pool, out_dtype, staging,
                        binarize, n_p, B):
    R = B * H
    n_out = len(out_ks)
    slot_for_level = tuple(out_ks.index(k) if k in out_ks else None for k in chain)

    in_specs = [pl.BlockSpec((R, W), lambda i: (i, 0))]
    in_specs += [pl.BlockSpec((W, W // 2), lambda i: (0, 0)) for _ in range(n_p)]

    out_shape = tuple(
        jax.ShapeDtypeStruct((NC * H // k, W // k), out_dtype) for k in out_ks)
    out_specs = tuple(
        pl.BlockSpec((R // k, W // k), lambda i: (i, 0)) for k in out_ks)

    scratch_shapes = []
    if staging:
        scratch_shapes.append(pltpu.VMEM((R, W), jnp.float32))
    elif len(chain) > 1:
        scratch_shapes.append(pltpu.VMEM((R // 2, W // 2), jnp.float32))

    kernel = functools.partial(
        _pyramid_kernel, pool=pool, chain=tuple(chain),
        slot_for_level=slot_for_level, n_p=n_p, n_out=n_out,
        staging=staging, binarize=binarize)

    return pl.pallas_call(
        kernel,
        out_shape=out_shape,
        grid=(NC // B,),
        in_specs=in_specs,
        out_specs=out_specs,
        scratch_shapes=scratch_shapes,
        compiler_params=pltpu.CompilerParams(dimension_semantics=("parallel",)),
    )


# ---------------------------------------------------------------------------
# Module wrapper (matches the PyTorch forward semantics)
# ---------------------------------------------------------------------------
class ImagePyramids:
    """JAX / Pallas-TPU port of the PyTorch ImagePyramids module (NCHW)."""

    def __init__(self, scales, pool="avg"):
        if pool not in ("avg", "max"):
            raise NotImplementedError()
        self.scales = tuple(int(s) for s in scales)
        self.pool = pool

    def __call__(self, x):
        N, C, H, W = x.shape
        req_ks = [1 << s for s in self.scales]
        out_ks = sorted({k for k in req_ks if k > 1})

        by_k = {1: x}          # k == 1 pooling is the identity -> no HBM round trip
        if out_ks:
            k_max = out_ks[-1]
            assert H % k_max == 0 and W % k_max == 0, \
                "H, W must be divisible by 2**max(scales)"

            is_bool = (x.dtype == jnp.bool_)
            if is_bool:
                xk, out_dtype, staging = x.astype(jnp.uint8), jnp.dtype(jnp.uint8), True
            elif x.dtype == jnp.dtype(jnp.float32):
                xk, out_dtype, staging = x, x.dtype, False
            else:   # bf16 / f16 etc.: keep narrow HBM traffic, accumulate in f32 in VMEM
                xk, out_dtype, staging = x, x.dtype, True

            chain = [2 ** i for i in range(1, k_max.bit_length())]   # 2, 4, ..., k_max
            NC = N * C
            xr = xk.reshape(NC * H, W)

            # Static 0/1 matrices for the lane-direction reduce on the MXU.
            # Later (smaller) stages use the top-left (Wc, Wc//2) corner.
            w_i = jnp.arange(W, dtype=jnp.int32)[:, None]
            o_i = jnp.arange(W // 2, dtype=jnp.int32)[None, :]
            if self.pool == "avg":
                ps = (((w_i // 2) == o_i).astype(jnp.float32),)          # pairwise sum
            else:
                ps = ((w_i == 2 * o_i).astype(jnp.float32),              # pick even lane
                      (w_i == 2 * o_i + 1).astype(jnp.float32))          # pick odd lane

            B = _choose_planes_per_block(
                NC, H, W, out_ks, chain,
                jnp.dtype(xk.dtype).itemsize, jnp.dtype(out_dtype).itemsize,
                staging, len(ps))

            call = _build_pyramid_call(NC, H, W, out_ks, chain, self.pool,
                                       out_dtype, staging, is_bool, len(ps), B)
            outs = call(xr, *ps)
            for k, o2 in zip(out_ks, outs):
                o4 = o2.reshape(N, C, H // k, W // k)
                if is_bool:
                    o4 = o4.astype(jnp.bool_)   # cheap 1-byte cast on the small outputs
                by_k[k] = o4

        return [by_k[k] for k in req_ks]


# ---------------------------------------------------------------------------
# Pure-JAX reference + self-test
# ---------------------------------------------------------------------------
def _ref_pool(x, k, pool):
    N, C, H, W = x.shape
    xr = x.reshape(N, C, H // k, k, W // k, k)
    if pool == "avg":
        return jnp.mean(xr, axis=(3, 5))
    return jnp.max(xr, axis=(3, 5))


if __name__ == "__main__":
    N, C, H, W = 2, 4, 16, 16
    key = jax.random.PRNGKey(0)
    # Small-integer-valued f32 data keeps every pooled intermediate exactly
    # representable on the MXU path, so the checks below can be tight.
    x = jax.random.randint(key, (N, C, H, W), -8, 8).astype(jnp.float32)

    scales = [0, 1, 2]

    # avg pyramid (includes the identity scale 0)
    outs = ImagePyramids(scales, pool="avg")(x)
    outs = [jax.block_until_ready(o) for o in outs]
    for s, o in zip(scales, outs):
        k = 1 << s
        assert o.shape == (N, C, H // k, W // k), o.shape
        ref = _ref_pool(x, k, "avg")
        assert jnp.allclose(o, ref, atol=1e-5, rtol=1e-5), f"avg mismatch at scale {s}"

    # max pyramid
    outs_m = ImagePyramids([1, 2], pool="max")(x)
    outs_m = [jax.block_until_ready(o) for o in outs_m]
    for s, o in zip([1, 2], outs_m):
        k = 1 << s
        ref = _ref_pool(x, k, "max")
        assert jnp.allclose(o, ref, atol=1e-5, rtol=1e-5), f"max mismatch at scale {s}"

    # bool path (cast to float, pool, cast back -> nonzero = True), as in torch
    xb = jax.random.uniform(jax.random.PRNGKey(1), (N, C, H, W)) > 0.5
    outs_b = ImagePyramids(scales, pool="avg")(xb)
    outs_b = [jax.block_until_ready(o) for o in outs_b]
    for s, o in zip(scales, outs_b):
        k = 1 << s
        ref_b = _ref_pool(xb.astype(jnp.float32), k, "avg").astype(jnp.bool_)
        assert o.dtype == jnp.bool_ and bool(jnp.all(o == ref_b)), \
            f"bool mismatch at scale {s}"

    print("KERNEL_OK")
</pallas_src>

<mosaic_0001>
module attributes {stable_mosaic.version = 11 : i64} {
  func.func @_pyramid_kernel(%arg0: i32, %arg1: memref<64x16xf32, #tpu.memory_space<vmem>>, %arg2: memref<16x8xf32, #tpu.memory_space<vmem>>, %arg3: memref<32x8xf32, #tpu.memory_space<vmem>>, %arg4: memref<16x4xf32, #tpu.memory_space<vmem>>, %arg5: memref<32x8xf32, #tpu.memory_space<vmem>>) attributes {dimension_semantics = [#tpu.dimension_semantics<parallel>], iteration_bounds = array<i64: 2>, scalar_prefetch = 0 : i64, scratch_operands = 1 : i64, tpu.core_type = #tpu.core_type<tc>, window_params = [{transform_indices = @transform_0, window_bounds = array<i64: 64, 16>}, {pipeline_mode = #tpu.pipeline_mode<synchronous>, transform_indices = @transform_1, window_bounds = array<i64: 16, 8>}, {transform_indices = @transform_2, window_bounds = array<i64: 32, 8>}, {transform_indices = @transform_3, window_bounds = array<i64: 16, 4>}]} {
    %c0 = arith.constant 0 : index
    %c0_0 = arith.constant 0 : index
    %0 = tpu.strided_load %arg1[%c0, %c0_0] {strides = array<i32: 2, 1>} : memref<64x16xf32, #tpu.memory_space<vmem>>, vector<32x16xf32>
    %c1 = arith.constant 1 : index
    %c0_1 = arith.constant 0 : index
    %1 = tpu.strided_load %arg1[%c1, %c0_1] {strides = array<i32: 2, 1>} : memref<64x16xf32, #tpu.memory_space<vmem>>, vector<32x16xf32>
    %2 = arith.addf %0, %1 : vector<32x16xf32>
    %c0_2 = arith.constant 0 : index
    %c0_3 = arith.constant 0 : index
    %3 = vector.load %arg2[%c0_2, %c0_3] : memref<16x8xf32, #tpu.memory_space<vmem>>, vector<16x8xf32>
    %cst = arith.constant dense<0.000000e+00> : vector<32x8xf32>
    %4 = tpu.matmul %2, %3, %cst {dimension_numbers = #tpu.dot_dimension_numbers<[1], [0], [0], [1], [0, 0, 1, 1], [], []>, precision = #tpu.contract_precision<fp32>} : vector<32x16xf32>, vector<16x8xf32>, vector<32x8xf32> -> vector<32x8xf32>
    %cst_4 = arith.constant 2.500000e-01 : f32
    %5 = vector.broadcast %cst_4 : f32 to vector<32x8xf32>
    %6 = arith.mulf %4, %5 : vector<32x8xf32>
    %c0_5 = arith.constant 0 : index
    %c0_6 = arith.constant 0 : index
    %7 = vector.load %arg3[%c0_5, %c0_6] : memref<32x8xf32, #tpu.memory_space<vmem>>, vector<32x8xf32>
    tpu.vector_store %arg3[%c0_5, %c0_6], %6 {strides = array<i32>} : memref<32x8xf32, #tpu.memory_space<vmem>>, vector<32x8xf32>,
    %c0_7 = arith.constant 0 : index
    %c0_8 = arith.constant 0 : index
    %8 = vector.load %arg5[%c0_7, %c0_8] : memref<32x8xf32, #tpu.memory_space<vmem>>, vector<32x8xf32>
    tpu.vector_store %arg5[%c0_7, %c0_8], %4 {strides = array<i32>} : memref<32x8xf32, #tpu.memory_space<vmem>>, vector<32x8xf32>,
    %c0_9 = arith.constant 0 : index
    %c0_10 = arith.constant 0 : index
    %9 = tpu.strided_load %arg5[%c0_9, %c0_10] {strides = array<i32: 2, 1>} : memref<32x8xf32, #tpu.memory_space<vmem>>, vector<16x8xf32>
    %c1_11 = arith.constant 1 : index
    %c0_12 = arith.constant 0 : index
    %10 = tpu.strided_load %arg5[%c1_11, %c0_12] {strides = array<i32: 2, 1>} : memref<32x8xf32, #tpu.memory_space<vmem>>, vector<16x8xf32>
    %11 = arith.addf %9, %10 : vector<16x8xf32>
    %c0_13 = arith.constant 0 : index
    %c0_14 = arith.constant 0 : index
    %12 = vector.load %arg2[%c0_13, %c0_14] : memref<16x8xf32, #tpu.memory_space<vmem>>, vector<8x4xf32>
    %cst_15 = arith.constant dense<0.000000e+00> : vector<16x4xf32>
    %13 = tpu.matmul %11, %12, %cst_15 {dimension_numbers = #tpu.dot_dimension_numbers<[1], [0], [0], [1], [0, 0, 1, 1], [], []>, precision = #tpu.contract_precision<fp32>} : vector<16x8xf32>, vector<8x4xf32>, vector<16x4xf32> -> vector<16x4xf32>
    %cst_16 = arith.constant 6.250000e-02 : f32
    %14 = vector.broadcast %cst_16 : f32 to vector<16x4xf32>
    %15 = arith.mulf %13, %14 : vector<16x4xf32>
    %c0_17 = arith.constant 0 : index
    %c0_18 = arith.constant 0 : index
    %16 = vector.load %arg4[%c0_17, %c0_18] : memref<16x4xf32, #tpu.memory_space<vmem>>, vector<16x4xf32>
    tpu.vector_store %arg4[%c0_17, %c0_18], %15 {strides = array<i32>} : memref<16x4xf32, #tpu.memory_space<vmem>>, vector<16x4xf32>,
    return
  }
  func.func @transform_0(%arg0: i32) -> (i32, i32) {
    %c0_i32 = arith.constant 0 : i32
    %c0_i32_0 = arith.constant 0 : i32
    return %arg0, %c0_i32 : i32, i32
  }
  func.func @transform_1(%arg0: i32) -> (i32, i32) {
    %c0_i32 = arith.constant 0 : i32
    %c0_i32_0 = arith.constant 0 : i32
    %c0_i32_1 = arith.constant 0 : i32
    return %c0_i32, %c0_i32_0 : i32, i32
  }
  func.func @transform_2(%arg0: i32) -> (i32, i32) {
    %c0_i32 = arith.constant 0 : i32
    %c0_i32_0 = arith.constant 0 : i32
    return %arg0, %c0_i32 : i32, i32
  }
  func.func @transform_3(%arg0: i32) -> (i32, i32) {
    %c0_i32 = arith.constant 0 : i32
    %c0_i32_0 = arith.constant 0 : i32
    return %arg0, %c0_i32 : i32, i32
  }
}

</mosaic_0001>

<bundles_post_ra>
// kernel: tpu_custom_call.1
= control target key start
LH: loop header
LB: loop body
LE: loop exit
PB: predicated region body
PF: predicated region fallthrough
CT: control target
= control target key end

     0   :  { %s1679_s12 = smov 0   ;;  %s1765_s0 = inlined_call_operand.vmem [shape: f32[128,16], index: 0, kind: input, shape index: {}]   ;;  %s1766_s1 = inlined_call_operand.vmem [shape: f32[16,8], index: 1, kind: input, shape index: {}]   ;;  %s1767_s2 = inlined_call_operand.vmem [shape: f32[64,8], index: 2, kind: output, shape index: {0}]   ;;  %s1768_s3 = inlined_call_operand.vmem [shape: f32[32,4], index: 3, kind: output, shape index: {1}]  }
   0x1 LB: > { %s1685_s13 = sadd.s32 4294967295, %s1657_s12   ;;  %p1427_p0 = scmp.ge.s32.totalorder %s1657_s12, 1  ;;  %s1657_s12 = sphi %s1679_s12, %s14_s12  }
   0x2   : > { %p141_p1 = scmp.lt.s32.totalorder %s1657_s12, 3 }
   0x4   : > { %p142_p2 = pnand %p1427_p0, %p141_p1 }
   0x5   : > { %v207_v0 = vld [vmem:[%s1766_s1] sm:$0xff] (!%p142_p2)  ;;  %v208_v1 = vld [vmem:[%s1766_s1 + $0x8] sm:$0xff] (!%p142_p2)  ;;  %s1428_s18 = sshll.u32 (!%p142_p2), %s1685_s13, 3  ;;  %vm209_vm0 = vcmask (!%p142_p2), 130048   ;;  %s1430_s23 = sshll.u32 (!%p142_p2), %s1685_s13, 2  ;;  %vm814_vm1 = vcmask (!%p142_p2), 64512  }
   0x6   : > { %145 = sbr.rel (%p142_p2) target bundleno = 551 (0x227), region = 28  ;;  %v1696_v2 = vand.u32 (!%p142_p2), 4294901760, %v207_v0  ;;  %v226_v3 = vand.u32 (!%p142_p2), 4294901760, %v208_v1  ;;  %p171_p3 = scmp.lt.s32.totalorder (!%p142_p2), %s1428_s18, 15  ;;  %vm1330_vm2 = vcmask (!%p142_p2), 31744  }
   0x7   : > { %p177_p4 = scmp.lt.s32.totalorder (!%p142_p2), %s1430_s23, 7  ;;  %s1432_s28 = sshll.u32 (!%p142_p2), %s1685_s13, 1 }
   0x8   : > { %v1699_v4 = vsub.f32 (!%p142_p2), %v207_v0, %v1696_v2  ;;  %v1701_v5 = vsub.f32 (!%p142_p2), %v208_v1, %v226_v3  ;;  %v1704_v6 = vpack.c.bf16 (!%p142_p2), %v226_v3, %v1696_v2  ;;  %p183_p5 = scmp.lt.s32.totalorder (!%p142_p2), %s1432_s28, 3 }
   0xa   : > { %v1707_v7 = vand.u32 (!%p142_p2), 4294901760, %v1699_v4  ;;  %v339_v8 = vand.u32 (!%p142_p2), 4294901760, %v1701_v5  ;;  %1588 = vmatprep.subr.bf16.mxu1 (!%p142_p2), %v1704_v6  ;;  %v1595_v25 = vpack.c.bf16 (!%p142_p2), %v1701_v5, %v1699_v4 }
   0xb   : > { %1590 = vmatpush3.bf16.msra.mxu1 (!%p142_p2), %v1704_v6 }
   0xc   : > { %v333_v9 = vsub.f32 (!%p142_p2), %v1699_v4, %v1707_v7  ;;  %v340_v10 = vsub.f32 (!%p142_p2), %v1701_v5, %v339_v8  ;;  %v1603_v50 = vpack.c.bf16 (!%p142_p2), %v339_v8, %v1707_v7 }
   0xd   : > { %s1770_s18 = smov (!%p171_p3, %s1428_s18), 15  ;;  %s1772_s23 = smov (!%p177_p4, %s1430_s23), 7 }
   0xe   : > { %s1429_s19 = sshll.u32 %s1770_s18, 3  ;;  %v1718_v18 = vand.u32 4294901760, %v333_v9  ;;  %v341_v19 = vand.u32 4294901760, %v340_v10  ;;  %s1431_s24 = sshll.u32 %s1772_s23, 3 }
   0xf   : > { %s174_s22 = scalar_lea.vmem %s1765_s0, %s1429_s19  ;;  %s180_s27 = scalar_lea.vmem %s1767_s2, %s1431_s24 }
  0x10   : > { %v188_v11 = vld [vmem:[%s174_s22] ss:$2 sm:$0xff]  ;;  %v1437_v12 = vld [vmem:[%s174_s22 + $0x1] ss:$2 sm:$0xff]  ;;  %v1434_v13 = vld [vmem:[%s174_s22 + $0x10] ss:$2 sm:$0xff]  ;;  %v1591_v27 = vpack.c.bf16 %v341_v19, %v1718_v18 }
  0x11   : > { %v203_v14 = vadd.f32 %v1437_v12, %v188_v11  ;;  %v1438_v15 = vld [vmem:[%s174_s22 + $0x11] ss:$2 sm:$0xff]  ;;  %v1435_v16 = vld [vmem:[%s174_s22 + $0x20] ss:$2 sm:$0xff]  ;;  %v1439_v17 = vld [vmem:[%s174_s22 + $0x21] ss:$2 sm:$0xff] }
  0x12   : > { %v204_v20 = vadd.f32 %v1438_v15, %v1434_v13  ;;  %v205_v21 = vadd.f32 %v1439_v17, %v1435_v16  ;;  %v1436_v22 = vld [vmem:[%s174_s22 + $0x30] ss:$2 sm:$0xff]  ;;  %v1440_v23 = vld [vmem:[%s174_s22 + $0x31] ss:$2 sm:$0xff]  ;;  %1592 = vmatprep.subr.bf16.mxu0 %v1591_v27  ;;  %1611 = vmatprep.subr.bf16.mxu1 %v1591_v27  ;;  %s1774_s28 = smov (!%p183_p5, %s1432_s28), 3 }
  0x13   : > { %v211_v24 = vsel %vm209_vm0, %v203_v14, 0  ;;  %v206_v26 = vadd.f32 %v1440_v23, %v1436_v22  ;;  %1594 = vmatpush3.bf16.msra.mxu0 %v1591_v27  ;;  %s1433_s29 = sshll.u32 %s1774_s28, 3 }
  0x14   : > { %v289_v28 = vand.u32 4294901760, %v211_v24  ;;  %v214_v29 = vsel %vm209_vm0, %v204_v20, 0  ;;  %v217_v30 = vsel %vm209_vm0, %v205_v21, 0  ;;  %1596 = vmatprep.subr.bf16.mxu0 %v1595_v25  ;;  %s186_s5 = scalar_lea.vmem %s1768_s3, %s1433_s29 }
  0x15   : > { %v299_v31 = vand.u32 4294901760, %v214_v29  ;;  %v309_v32 = vand.u32 4294901760, %v217_v30  ;;  %v220_v33 = vsel %vm209_vm0, %v206_v26, 0 }
  0x16   : > { %1511 = vmatprep.mubr.f32.mxu0 %v289_v28  ;;  %v290_v34 = vsub.f32 %v211_v24, %v289_v28  ;;  %v319_v35 = vand.u32 4294901760, %v220_v33 }
  0x17   : > { %v300_v36 = vsub.f32 %v214_v29, %v299_v31  ;;  %v310_v37 = vsub.f32 %v217_v30, %v309_v32  ;;  %1512 = vmatmul.mubr.f32.vlgmr.msra.gmra.mrb[0].mxu0 %v299_v31 }
  0x18   : > { %v320_v38 = vsub.f32 %v220_v33, %v319_v35  ;;  %v291_v39 = vand.u32 4294901760, %v290_v34  ;;  %1598 = vmatpush3.bf16.msra.mxu0 %v1595_v25  ;;  %1521 = vmatprep.mubr.f32.mxu0 %v290_v34 }
  0x19   : > { %v301_v40 = vand.u32 4294901760, %v300_v36  ;;  %v311_v41 = vand.u32 4294901760, %v310_v37  ;;  %1600 = vmatprep.subr.bf16.mxu0 %v1704_v6 }
  0x1a   : > { %v292_v42 = vsub.f32 %v290_v34, %v291_v39  ;;  %v321_v43 = vand.u32 4294901760, %v320_v38 }
  0x1b   : > { %v302_v44 = vsub.f32 %v300_v36, %v301_v40  ;;  %v312_v45 = vsub.f32 %v310_v37, %v311_v41 }
  0x1c   : > { %v293_v46 = vand.u32 4294901760, %v292_v42  ;;  %v322_v47 = vsub.f32 %v320_v38, %v321_v43 }
  0x1d   : > { %v303_v48 = vand.u32 4294901760, %v302_v44  ;;  %v313_v49 = vand.u32 4294901760, %v312_v45 }
  0x1e   : > { %1501 = vmatprep.mubr.f32.mxu1 %v293_v46  ;;  %v323_v51 = vand.u32 4294901760, %v322_v47 }
  0x1f   : > { %1502 = vmatmul.mubr.f32.vlgmr.msra.gmra.mrb[0].mxu1 %v303_v48  ;;  %1522 = vmatmul.mubr.f32.vlgmr.msra.gmra.mrb[0].mxu0 %v300_v36 }
  0x20   : > { %1504 = vmatprep.mubr.f32.mxu1 %v313_v49  ;;  %1612 = vmatpush3.bf16.msra.mxu1 %v1591_v27 }
  0x21   : > { %1557 = vmatprep.subr.mxu1 %v1696_v2  ;;  %1602 = vmatpush3.bf16.msra.mxu0 %v1704_v6 }
  0x22   : > { %1524 = vmatprep.mubr.f32.mxu0 %v310_v37  ;;  %1604 = vmatprep.subr.bf16.mxu0 %v1603_v50 }
  0x23   : > { %1505 = vmatmul.mubr.f32.gmra.mrb[2].mxu1 %v323_v51  ;;  %1525 = vmatmul.mubr.f32.gmra.mrb[2].mxu0 %v320_v38 }
  0x24   : > { %1514 = vmatprep.mubr.f32.mxu1 %v309_v32  ;;  %1531 = vmatprep.mubr.f32.mxu0 %v291_v39 }
  0x27   : > { %1532 = vmatmul.mubr.f32.vlgmr.msra.gmra.mrb[0].mxu0 %v301_v40 }
  0x28   : > { %1606 = vmatpush3.bf16.msra.mxu0 %v1603_v50  ;;  %1534 = vmatprep.mubr.f32.mxu0 %v311_v41 }
  0x29   : > { %1608 = vmatprep.subr.bf16.mxu0 %v1704_v6 }
  0x2b   : > { %1515 = vmatmul.mubr.f32.vlgmr.msra.gmra.mrb[2].mxu1 %v319_v35  ;;  %1535 = vmatmul.mubr.f32.gmra.mrb[2].mxu0 %v321_v43 }
  0x2c   : > { %1558 = vmatpush3.msra.mxu1 %v1696_v2  ;;  %1541 = vmatprep.mubr.f32.mxu0 %v289_v28 }
  0x2d   : > { %1562 = vmatprep.subr.mxu1 %v1718_v18 }
  0x2f   : > { %1542 = vmatmul.mubr.f32.vlgmr.msra.gmra.mrb[0].mxu0 %v299_v31 }
  0x30   : > { %1610 = vmatpush3.bf16.msra.mxu0 %v1704_v6  ;;  %1544 = vmatprep.mubr.f32.mxu0 %v309_v32 }
  0x33   : > { %1545 = vmatmul.mubr.f32.gmra.mrb[2].mxu0 %v319_v35 }
  0x34   : > { %1551 = vmatprep.mubr.f32.mxu0 %v289_v28 }
  0x37   : > { %1552 = vmatmul.mubr.f32.vlgmr.msra.gmra.mrb[0].mxu0 %v299_v31 }
  0x38   : > { %1554 = vmatprep.mubr.f32.mxu0 %v309_v32 }
  0x3b   : > { %1555 = vmatmul.mubr.f32.gmra.mrb[2].mxu0 %v319_v35 }
  0xf2   : > { %v1503_v52 = vpop.f32.mrb[0].mxu1 }
  0xf3   : > { %v295_v53 = vpop.f32.mrb[1].mxu1 }
  0xfe   : > { %v1516_v54 = vpop.f32.mrb[2].mxu1 }
  0xff   : > { %v418_v55 = vpop.f32.mrb[3].mxu1 }
 0x10a   : > { %v1553_v56 = vpop.f32.mrb[0].mxu0 }
 0x10b   : > { %v1613_v57 = vadd.f32 %v1553_v56, %v1503_v52  ;;  %v788_v58 = vpop.f32.mrb[1].mxu0 }
 0x10c   : > { %v1614_v59 = vadd.f32 %v788_v58, %v295_v53 }
 0x10d   : > { %820 = vst.msk [vmem:[#allocation2 + $0x8] sm:$0xff] %vm814_vm1, %v1613_v57  ;;  %v811_v62 = vmul.f32 0.25, %v1613_v57 }
 0x10e   : > { %v810_v60 = vmul.f32 0.25, %v1614_v59  ;;  %819 = vst.msk [vmem:[#allocation2] sm:$0xff] %vm814_vm1, %v1614_v59  ;;  %v1556_v61 = vpop.f32.mrb[2].mxu0 }
 0x10f   : > { %v1615_v63 = vadd.f32 %v1556_v61, %v1516_v54  ;;  %v800_v0 = vpop.f32.mrb[3].mxu0  ;;  %816 = vst.msk [vmem:[%s180_s27 + $0x8] sm:$0xff] %vm814_vm1, %v811_v62 }
 0x110   : > { %815 = vst.msk [vmem:[%s180_s27] sm:$0xff] %vm814_vm1, %v810_v60  ;;  %v1616_v1 = vadd.f32 %v800_v0, %v418_v55 }
 0x111   : > { %822 = vst.msk [vmem:[#allocation2 + $0x18] sm:$0xff] %vm814_vm1, %v1615_v63  ;;  %v813_v5 = vmul.f32 0.25, %v1615_v63 }
 0x112   : > { %v812_v3 = vmul.f32 0.25, %v1616_v1  ;;  %821 = vst.msk [vmem:[#allocation2 + $0x10] sm:$0xff] %vm814_vm1, %v1616_v1 }
 0x113   : > { %818 = vst.msk [vmem:[%s180_s27 + $0x18] sm:$0xff] %vm814_vm1, %v813_v5 }
 0x114   : > { %817 = vst.msk [vmem:[%s180_s27 + $0x10] sm:$0xff] %vm814_vm1, %v812_v3 }
 0x115   : > { %v823_v6 = vld [vmem:[#allocation2] ss:$2 sm:$0xff]  ;;  %v827_v8 = vld [vmem:[#allocation2 + $0x1] ss:$2 sm:$0xff] }
 0x116   : > { %v830_v9 = vadd.f32 %v827_v8, %v823_v6 }
 0x118   : > { %v834_v10 = vsel %vm814_vm1, %v830_v9, 0 }
 0x119   : > { %v905_v11 = vand.u32 4294901760, %v834_v10  ;;  %v825_v12 = vld [vmem:[#allocation2 + $0x10] ss:$2 sm:$0xff]  ;;  %v829_v13 = vld [vmem:[#allocation2 + $0x11] ss:$2 sm:$0xff] }
 0x11a   : > { %v831_v14 = vadd.f32 %v829_v13, %v825_v12 }
 0x11b   : > { %v906_v15 = vsub.f32 %v834_v10, %v905_v11 }
 0x11c   : > { %v837_v16 = vsel %vm814_vm1, %v831_v14, 0 }
 0x11d   : > { %v907_v17 = vand.u32 4294901760, %v906_v15  ;;  %v915_v19 = vand.u32 4294901760, %v837_v16 }
 0x11f   : > { %v908_v20 = vsub.f32 %v906_v15, %v907_v17  ;;  %v916_v21 = vsub.f32 %v837_v16, %v915_v19 }
 0x121   : > { %v909_v22 = vand.u32 4294901760, %v908_v20  ;;  %v917_v23 = vand.u32 4294901760, %v916_v21 }
 0x123   : > { %1559 = vmatprep.mubr.f32.mxu1 %v909_v22  ;;  %v918_v24 = vsub.f32 %v916_v21, %v917_v23 }
 0x125   : > { %v919_v25 = vand.u32 4294901760, %v918_v24 }
 0x127   : > { %1560 = vmatmul.mubr.f32.vlgmr.msra.gmra.mrb[4].mxu1 %v919_v25 }
 0x128   : > { %1563 = vmatpush3.msra.mxu1 %v1718_v18  ;;  %1564 = vmatprep.mubr.f32.mxu1 %v905_v11 }
 0x129   : > { %1567 = vmatprep.subr.mxu1 %v1699_v4 }
 0x12f   : > { %1565 = vmatmul.mubr.f32.vlgmr.msra.gmra.mrb[4].mxu1 %v915_v19 }
 0x130   : > { %1568 = vmatpush3.msra.mxu1 %v1699_v4  ;;  %1569 = vmatprep.mubr.f32.mxu1 %v906_v15 }
 0x131   : > { %1572 = vmatprep.subr.mxu1 %v1696_v2 }
 0x137   : > { %1570 = vmatmul.mubr.f32.vlgmr.msra.gmra.mrb[4].mxu1 %v916_v21 }
 0x138   : > { %1573 = vmatpush3.msra.mxu1 %v1696_v2  ;;  %1574 = vmatprep.mubr.f32.mxu1 %v907_v17 }
 0x139   : > { %1577 = vmatprep.subr.mxu1 %v1707_v7 }
 0x13f   : > { %1575 = vmatmul.mubr.f32.vlgmr.msra.gmra.mrb[4].mxu1 %v917_v23 }
 0x140   : > { %1578 = vmatpush3.msra.mxu1 %v1707_v7  ;;  %1579 = vmatprep.mubr.f32.mxu1 %v905_v11 }
 0x141   : > { %1582 = vmatprep.subr.mxu1 %v1696_v2 }
 0x147   : > { %1580 = vmatmul.mubr.f32.vlgmr.msra.gmra.mrb[4].mxu1 %v915_v19 }
 0x148   : > { %1583 = vmatpush3.msra.mxu1 %v1696_v2  ;;  %1584 = vmatprep.mubr.f32.mxu1 %v905_v11 }
 0x14f   : > { %1585 = vmatmul.mubr.f32.vlgmr.msra.gmra.mrb[4].mxu1 %v915_v19 }
 0x222   : > { %v1586_v4 = vpop.f32.mrb[4].mxu1 }
 0x223   : > { %v1318_v18 = vpop.f32.mrb[5].mxu1  ;;  %v1329_v26 = vmul.f32 0.0625, %v1586_v4 }
 0x224   : > { %v1328_v7 = vmul.f32 0.0625, %v1318_v18 }
 0x225   : > { %1332 = vst.msk [vmem:[%s186_s5 + $0x8] sm:$0xff] %vm1330_vm2, %v1329_v26 }
 0x226   : > { %1331 = vst.msk [vmem:[%s186_s5] sm:$0xff] %vm1330_vm2, %v1328_v7 }
 0x227 PF: > { %s14_s12 = sadd.s32 1, %s1657_s12  }
 0x228   : > { %p11_p6 = scmp.ge.s32.totalorder %s14_s12, 4  }
 0x22a   :  { %13 = sbr.rel (!%p11_p6) target bundleno = 1 (0x1), region = 80 }

</bundles_post_ra>
